<compile_context>
chip_gen: v5e
topology: v5e:2x2
jax: 0.10.0
libtpu: 0.0.40
codegen_flags: <defaults>
</compile_context>

<pallas_src>
import functools

import numpy as np
import jax
import jax.numpy as jnp
from jax.experimental import pallas as pl
from jax.experimental.pallas import tpu as pltpu


def _num_tensorcores() -> int:
    """TensorCores per chip: 2 on v7x, 1 on v5e/v6e ('parallel' grid axes shard over these)."""
    try:
        info = pltpu.get_tpu_info()
        for attr in ("tensorcores_per_chip", "num_tensorcores", "num_cores",
                     "cores_per_chip", "num_cores_per_chip"):
            v = getattr(info, attr, None)
            if isinstance(v, int) and 1 <= v <= 8:
                return v
    except Exception:
        pass
    try:
        kind = jax.devices()[0].device_kind.lower()
        if "v7" in kind or "7x" in kind:
            return 2
    except Exception:
        pass
    return 1


def _conv_kernel(x_ref, w_ref, m_ref, o_ref, col_ref, *, H, W, K, Cin_pad, NB):
    """Fused im2col + single batched MXU matmul for NB images.

    x_ref:   (NB, Cin_pad, H*W)     lane-dense, channel-padded input slab (VMEM)
    w_ref:   (Cout, K*K*Cin_pad)    flattened weight, [kh, kw, cin]-ordered (VMEM)
    m_ref:   (K*K*Cin_pad, H*W)     precomputed zero-padding masks, 1.0/0.0 (VMEM)
    o_ref:   (NB, Cout, H*W)        lane-dense output slab (VMEM)
    col_ref: (K*K*Cin_pad, NB*H*W)  im2col scratch (VMEM)
    """
    HW = H * W
    pad = K // 2

    # Load each image once; all loops below are fully unrolled at trace time.
    x_imgs = [x_ref[b] for b in range(NB)]          # each (Cin_pad, HW)

    for kh in range(K):
        for kw in range(K):
            t = kh * K + kw
            dh = kh - pad
            dw = kw - pad
            s = dh * W + dw                          # want patch[f] = x_flat[f + s]
            sh = (-s) % HW                           # jnp.roll-style shift amount
            # Batch-invariant mask for this tap: zeroes out-of-image (wrapped) taps.
            mask = m_ref[pl.ds(t * Cin_pad, Cin_pad), :]
            for b in range(NB):
                shifted = (x_imgs[b] if sh == 0
                           else pltpu.roll(x_imgs[b], shift=sh, axis=1))
                # Full-tile store: sublane offset t*Cin_pad is a multiple of 8,
                # lane offset b*HW is a multiple of 128 here.
                col_ref[pl.ds(t * Cin_pad, Cin_pad), pl.ds(b * HW, HW)] = shifted * mask

    # One fused MXU matmul per grid step, batched over the NB images:
    # (Cout, KKC_pad) @ (KKC_pad, NB*HW) -> (Cout, NB*HW).
    # Default MXU precision for f32; checked to 1e-4 against the f32 reference.
    out = jnp.dot(w_ref[...], col_ref[...], preferred_element_type=jnp.float32)
    for b in range(NB):
        o_ref[b] = out[:, b * HW:(b + 1) * HW].astype(o_ref.dtype)


def conv_block_last(x_nchw, weight_oikk):
    """Forward pass of ConvBlock_last: Conv2d(stride=1, padding=K//2, bias=False).

    x_nchw:      (N, Cin, H, W)    float32
    weight_oikk: (Cout, Cin, K, K) float32 (PyTorch Conv2d layout)
    returns:     (N, Cout, H, W)   float32
    """
    N, Cin, H, W = x_nchw.shape
    Cout, Cin_w, K, K2 = weight_oikk.shape
    assert Cin == Cin_w and K == K2
    HW = H * W
    pad = K // 2

    # Pad Cin up to the f32 sublane tile so every im2col tap store is tile-aligned.
    Cin_pad = ((Cin + 7) // 8) * 8
    KKC = K * K * Cin_pad

    # Metadata-only reshape NCHW -> (N, Cin, H*W); pad channels with zero rows.
    x_flat = x_nchw.reshape(N, Cin, HW)
    if Cin_pad != Cin:
        x_flat = jnp.pad(x_flat, ((0, 0), (0, Cin_pad - Cin), (0, 0)))

    # Tiny weight relayout: (Cout,Cin,K,K) -> (Cout,K,K,Cin_pad) -> (Cout, K*K*Cin_pad),
    # contraction ordered [kh, kw, cin] to match the im2col rows.
    w_t = jnp.transpose(weight_oikk, (0, 2, 3, 1))
    if Cin_pad != Cin:
        w_t = jnp.pad(w_t, ((0, 0), (0, 0), (0, 0), (0, Cin_pad - Cin)))
    w2d = w_t.reshape(Cout, KKC)

    # Host-precomputed, batch-invariant zero-padding masks (replaces per-image
    # iota/compare work inside the kernel); passed as a small VMEM input.
    f = np.arange(HW)
    h_idx, w_idx = f // W, f % W
    tap_masks = np.empty((K * K, HW), dtype=np.float32)
    for kh in range(K):
        for kw in range(K):
            dh, dw = kh - pad, kw - pad
            valid = ((h_idx + dh >= 0) & (h_idx + dh < H) &
                     (w_idx + dw >= 0) & (w_idx + dw < W))
            tap_masks[kh * K + kw] = valid.astype(np.float32)
    mask_full = jnp.asarray(
        np.repeat(tap_masks[:, None, :], Cin_pad, axis=1).reshape(KKC, HW))

    # One grid step per TensorCore (G=1 on v5e/v6e, G=2 on v7x when N allows).
    n_tc = _num_tensorcores()
    G = n_tc if (n_tc > 1 and N >= n_tc and N % n_tc == 0) else 1
    NB = N // G

    # TODO(synk): for large Cin / H*W the (KKC, NB*HW) f32 col scratch can exceed
    # v7x's VMEM budget; add a spatial (HW) grid axis with halo masks and/or cast
    # col/weight to bf16 before scaling shapes up.
    kernel = functools.partial(
        _conv_kernel, H=H, W=W, K=K, Cin_pad=Cin_pad, NB=NB)

    out_flat = pl.pallas_call(
        kernel,
        out_shape=jax.ShapeDtypeStruct((N, Cout, HW), x_nchw.dtype),
        grid_spec=pltpu.PrefetchScalarGridSpec(
            num_scalar_prefetch=0,
            grid=(G,),
            in_specs=[
                # NB images per step, spatial flattened onto lanes.
                pl.BlockSpec((NB, Cin_pad, HW), lambda g: (g, 0, 0)),
                # Full weight and mask, resident across the (tiny) grid.
                pl.BlockSpec((Cout, KKC), lambda g: (0, 0)),
                pl.BlockSpec((KKC, HW), lambda g: (0, 0)),
            ],
            out_specs=pl.BlockSpec((NB, Cout, HW), lambda g: (g, 0, 0)),
            scratch_shapes=[pltpu.VMEM((KKC, NB * HW), jnp.float32)],
        ),
        compiler_params=pltpu.CompilerParams(
            dimension_semantics=(("parallel",) if G > 1 else ("arbitrary",)),
        ),
    )(x_flat, w2d, mask_full)

    # Free reshape back to NCHW (the slab is already (Cout, H*W) per image).
    return out_flat.reshape(N, Cout, H, W)


if __name__ == "__main__":
    # Shapes consistent with the module: Conv2d(in_size=4, out_size=8, kernel=3).
    N, Cin, H, W = 2, 4, 16, 16
    Cout, K = 8, 3

    key = jax.random.PRNGKey(0)
    kx, kw = jax.random.split(key)
    x = jax.random.normal(kx, (N, Cin, H, W), dtype=jnp.float32)
    # Deterministic "Kaiming-like" init for the conv weight (PyTorch layout: O,I,Kh,Kw).
    fan_in = Cin * K * K
    weight = jax.random.normal(kw, (Cout, Cin, K, K), dtype=jnp.float32) * (1.0 / fan_in ** 0.5)

    out = conv_block_last(x, weight)
    jax.block_until_ready(out)

    # Correctness check against XLA's native conv (same semantics as nn.Conv2d, bias=False).
    ref = jax.lax.conv_general_dilated(
        x, weight,
        window_strides=(1, 1),
        padding=((K // 2, K // 2), (K // 2, K // 2)),
        dimension_numbers=("NCHW", "OIHW", "NCHW"),
    )
    assert out.shape == (N, Cout, H, W)
    # Default MXU precision (f32 via multi-pass bf16); documented tolerance vs f32 ref.
    assert jnp.allclose(out, ref, atol=1e-4, rtol=1e-4), "mismatch vs reference conv"

    print("KERNEL_OK")
</pallas_src>

<mosaic_0001>
module attributes {stable_mosaic.version = 11 : i64} {
  func.func @_conv_kernel(%arg0: i32, %arg1: memref<2x8x256xf32, #tpu.memory_space<vmem>>, %arg2: memref<8x72xf32, #tpu.memory_space<vmem>>, %arg3: memref<72x256xf32, #tpu.memory_space<vmem>>, %arg4: memref<2x8x256xf32, #tpu.memory_space<vmem>>, %arg5: memref<72x512xf32, #tpu.memory_space<vmem>>) attributes {dimension_semantics = [#tpu.dimension_semantics<arbitrary>], iteration_bounds = array<i64: 1>, scalar_prefetch = 0 : i64, scratch_operands = 1 : i64, tpu.core_type = #tpu.core_type<tc>, window_params = [{transform_indices = @transform_0, window_bounds = array<i64: 2, 8, 256>}, {pipeline_mode = #tpu.pipeline_mode<synchronous>, transform_indices = @transform_1, window_bounds = array<i64: 8, 72>}, {pipeline_mode = #tpu.pipeline_mode<synchronous>, transform_indices = @transform_2, window_bounds = array<i64: 72, 256>}, {transform_indices = @transform_3, window_bounds = array<i64: 2, 8, 256>}]} {
    %c0 = arith.constant 0 : index
    %c0_0 = arith.constant 0 : index
    %c0_1 = arith.constant 0 : index
    %0 = vector.load %arg1[%c0, %c0_0, %c0_1] : memref<2x8x256xf32, #tpu.memory_space<vmem>>, vector<1x8x256xf32>
    %1 = vector.shape_cast %0 : vector<1x8x256xf32> to vector<8x256xf32>
    %c1 = arith.constant 1 : index
    %c0_2 = arith.constant 0 : index
    %c0_3 = arith.constant 0 : index
    %2 = vector.load %arg1[%c1, %c0_2, %c0_3] : memref<2x8x256xf32, #tpu.memory_space<vmem>>, vector<1x8x256xf32>
    %3 = vector.shape_cast %2 : vector<1x8x256xf32> to vector<8x256xf32>
    %c0_4 = arith.constant 0 : index
    %c0_5 = arith.constant 0 : index
    %4 = vector.load %arg3[%c0_4, %c0_5] : memref<72x256xf32, #tpu.memory_space<vmem>>, vector<8x256xf32>
    %c17_i32 = arith.constant 17 : i32
    %5 = tpu.dynamic_rotate %1 by %c17_i32 dim 1 : vector<8x256xf32>, i32 -> vector<8x256xf32>
    %6 = arith.mulf %5, %4 : vector<8x256xf32>
    %c0_6 = arith.constant 0 : index
    %c0_7 = arith.constant 0 : index
    %7 = vector.load %arg5[%c0_6, %c0_7] : memref<72x512xf32, #tpu.memory_space<vmem>>, vector<8x256xf32>
    tpu.vector_store %arg5[%c0_6, %c0_7], %6 {strides = array<i32>} : memref<72x512xf32, #tpu.memory_space<vmem>>, vector<8x256xf32>,
    %c17_i32_8 = arith.constant 17 : i32
    %8 = tpu.dynamic_rotate %3 by %c17_i32_8 dim 1 : vector<8x256xf32>, i32 -> vector<8x256xf32>
    %9 = arith.mulf %8, %4 : vector<8x256xf32>
    %c0_9 = arith.constant 0 : index
    %c256 = arith.constant 256 : index
    %10 = vector.load %arg5[%c0_9, %c256] : memref<72x512xf32, #tpu.memory_space<vmem>>, vector<8x256xf32>
    tpu.vector_store %arg5[%c0_9, %c256], %9 {strides = array<i32>} : memref<72x512xf32, #tpu.memory_space<vmem>>, vector<8x256xf32>,
    %c8 = arith.constant 8 : index
    %c0_10 = arith.constant 0 : index
    %11 = vector.load %arg3[%c8, %c0_10] : memref<72x256xf32, #tpu.memory_space<vmem>>, vector<8x256xf32>
    %c16_i32 = arith.constant 16 : i32
    %12 = tpu.dynamic_rotate %1 by %c16_i32 dim 1 : vector<8x256xf32>, i32 -> vector<8x256xf32>
    %13 = arith.mulf %12, %11 : vector<8x256xf32>
    %c8_11 = arith.constant 8 : index
    %c0_12 = arith.constant 0 : index
    %14 = vector.load %arg5[%c8_11, %c0_12] : memref<72x512xf32, #tpu.memory_space<vmem>>, vector<8x256xf32>
    tpu.vector_store %arg5[%c8_11, %c0_12], %13 {strides = array<i32>} : memref<72x512xf32, #tpu.memory_space<vmem>>, vector<8x256xf32>,
    %c16_i32_13 = arith.constant 16 : i32
    %15 = tpu.dynamic_rotate %3 by %c16_i32_13 dim 1 : vector<8x256xf32>, i32 -> vector<8x256xf32>
    %16 = arith.mulf %15, %11 : vector<8x256xf32>
    %c8_14 = arith.constant 8 : index
    %c256_15 = arith.constant 256 : index
    %17 = vector.load %arg5[%c8_14, %c256_15] : memref<72x512xf32, #tpu.memory_space<vmem>>, vector<8x256xf32>
    tpu.vector_store %arg5[%c8_14, %c256_15], %16 {strides = array<i32>} : memref<72x512xf32, #tpu.memory_space<vmem>>, vector<8x256xf32>,
    %c16 = arith.constant 16 : index
    %c0_16 = arith.constant 0 : index
    %18 = vector.load %arg3[%c16, %c0_16] : memref<72x256xf32, #tpu.memory_space<vmem>>, vector<8x256xf32>
    %c15_i32 = arith.constant 15 : i32
    %19 = tpu.dynamic_rotate %1 by %c15_i32 dim 1 : vector<8x256xf32>, i32 -> vector<8x256xf32>
    %20 = arith.mulf %19, %18 : vector<8x256xf32>
    %c16_17 = arith.constant 16 : index
    %c0_18 = arith.constant 0 : index
    %21 = vector.load %arg5[%c16_17, %c0_18] : memref<72x512xf32, #tpu.memory_space<vmem>>, vector<8x256xf32>
    tpu.vector_store %arg5[%c16_17, %c0_18], %20 {strides = array<i32>} : memref<72x512xf32, #tpu.memory_space<vmem>>, vector<8x256xf32>,
    %c15_i32_19 = arith.constant 15 : i32
    %22 = tpu.dynamic_rotate %3 by %c15_i32_19 dim 1 : vector<8x256xf32>, i32 -> vector<8x256xf32>
    %23 = arith.mulf %22, %18 : vector<8x256xf32>
    %c16_20 = arith.constant 16 : index
    %c256_21 = arith.constant 256 : index
    %24 = vector.load %arg5[%c16_20, %c256_21] : memref<72x512xf32, #tpu.memory_space<vmem>>, vector<8x256xf32>
    tpu.vector_store %arg5[%c16_20, %c256_21], %23 {strides = array<i32>} : memref<72x512xf32, #tpu.memory_space<vmem>>, vector<8x256xf32>,
    %c24 = arith.constant 24 : index
    %c0_22 = arith.constant 0 : index
    %25 = vector.load %arg3[%c24, %c0_22] : memref<72x256xf32, #tpu.memory_space<vmem>>, vector<8x256xf32>
    %c1_i32 = arith.constant 1 : i32
    %26 = tpu.dynamic_rotate %1 by %c1_i32 dim 1 : vector<8x256xf32>, i32 -> vector<8x256xf32>
    %27 = arith.mulf %26, %25 : vector<8x256xf32>
    %c24_23 = arith.constant 24 : index
    %c0_24 = arith.constant 0 : index
    %28 = vector.load %arg5[%c24_23, %c0_24] : memref<72x512xf32, #tpu.memory_space<vmem>>, vector<8x256xf32>
    tpu.vector_store %arg5[%c24_23, %c0_24], %27 {strides = array<i32>} : memref<72x512xf32, #tpu.memory_space<vmem>>, vector<8x256xf32>,
    %c1_i32_25 = arith.constant 1 : i32
    %29 = tpu.dynamic_rotate %3 by %c1_i32_25 dim 1 : vector<8x256xf32>, i32 -> vector<8x256xf32>
    %30 = arith.mulf %29, %25 : vector<8x256xf32>
    %c24_26 = arith.constant 24 : index
    %c256_27 = arith.constant 256 : index
    %31 = vector.load %arg5[%c24_26, %c256_27] : memref<72x512xf32, #tpu.memory_space<vmem>>, vector<8x256xf32>
    tpu.vector_store %arg5[%c24_26, %c256_27], %30 {strides = array<i32>} : memref<72x512xf32, #tpu.memory_space<vmem>>, vector<8x256xf32>,
    %c32 = arith.constant 32 : index
    %c0_28 = arith.constant 0 : index
    %32 = vector.load %arg3[%c32, %c0_28] : memref<72x256xf32, #tpu.memory_space<vmem>>, vector<8x256xf32>
    %33 = arith.mulf %1, %32 : vector<8x256xf32>
    %c32_29 = arith.constant 32 : index
    %c0_30 = arith.constant 0 : index
    %34 = vector.load %arg5[%c32_29, %c0_30] : memref<72x512xf32, #tpu.memory_space<vmem>>, vector<8x256xf32>
    tpu.vector_store %arg5[%c32_29, %c0_30], %33 {strides = array<i32>} : memref<72x512xf32, #tpu.memory_space<vmem>>, vector<8x256xf32>,
    %35 = arith.mulf %3, %32 : vector<8x256xf32>
    %c32_31 = arith.constant 32 : index
    %c256_32 = arith.constant 256 : index
    %36 = vector.load %arg5[%c32_31, %c256_32] : memref<72x512xf32, #tpu.memory_space<vmem>>, vector<8x256xf32>
    tpu.vector_store %arg5[%c32_31, %c256_32], %35 {strides = array<i32>} : memref<72x512xf32, #tpu.memory_space<vmem>>, vector<8x256xf32>,
    %c40 = arith.constant 40 : index
    %c0_33 = arith.constant 0 : index
    %37 = vector.load %arg3[%c40, %c0_33] : memref<72x256xf32, #tpu.memory_space<vmem>>, vector<8x256xf32>
    %c255_i32 = arith.constant 255 : i32
    %38 = tpu.dynamic_rotate %1 by %c255_i32 dim 1 : vector<8x256xf32>, i32 -> vector<8x256xf32>
    %39 = arith.mulf %38, %37 : vector<8x256xf32>
    %c40_34 = arith.constant 40 : index
    %c0_35 = arith.constant 0 : index
    %40 = vector.load %arg5[%c40_34, %c0_35] : memref<72x512xf32, #tpu.memory_space<vmem>>, vector<8x256xf32>
    tpu.vector_store %arg5[%c40_34, %c0_35], %39 {strides = array<i32>} : memref<72x512xf32, #tpu.memory_space<vmem>>, vector<8x256xf32>,
    %c255_i32_36 = arith.constant 255 : i32
    %41 = tpu.dynamic_rotate %3 by %c255_i32_36 dim 1 : vector<8x256xf32>, i32 -> vector<8x256xf32>
    %42 = arith.mulf %41, %37 : vector<8x256xf32>
    %c40_37 = arith.constant 40 : index
    %c256_38 = arith.constant 256 : index
    %43 = vector.load %arg5[%c40_37, %c256_38] : memref<72x512xf32, #tpu.memory_space<vmem>>, vector<8x256xf32>
    tpu.vector_store %arg5[%c40_37, %c256_38], %42 {strides = array<i32>} : memref<72x512xf32, #tpu.memory_space<vmem>>, vector<8x256xf32>,
    %c48 = arith.constant 48 : index
    %c0_39 = arith.constant 0 : index
    %44 = vector.load %arg3[%c48, %c0_39] : memref<72x256xf32, #tpu.memory_space<vmem>>, vector<8x256xf32>
    %c241_i32 = arith.constant 241 : i32
    %45 = tpu.dynamic_rotate %1 by %c241_i32 dim 1 : vector<8x256xf32>, i32 -> vector<8x256xf32>
    %46 = arith.mulf %45, %44 : vector<8x256xf32>
    %c48_40 = arith.constant 48 : index
    %c0_41 = arith.constant 0 : index
    %47 = vector.load %arg5[%c48_40, %c0_41] : memref<72x512xf32, #tpu.memory_space<vmem>>, vector<8x256xf32>
    tpu.vector_store %arg5[%c48_40, %c0_41], %46 {strides = array<i32>} : memref<72x512xf32, #tpu.memory_space<vmem>>, vector<8x256xf32>,
    %c241_i32_42 = arith.constant 241 : i32
    %48 = tpu.dynamic_rotate %3 by %c241_i32_42 dim 1 : vector<8x256xf32>, i32 -> vector<8x256xf32>
    %49 = arith.mulf %48, %44 : vector<8x256xf32>
    %c48_43 = arith.constant 48 : index
    %c256_44 = arith.constant 256 : index
    %50 = vector.load %arg5[%c48_43, %c256_44] : memref<72x512xf32, #tpu.memory_space<vmem>>, vector<8x256xf32>
    tpu.vector_store %arg5[%c48_43, %c256_44], %49 {strides = array<i32>} : memref<72x512xf32, #tpu.memory_space<vmem>>, vector<8x256xf32>,
    %c56 = arith.constant 56 : index
    %c0_45 = arith.constant 0 : index
    %51 = vector.load %arg3[%c56, %c0_45] : memref<72x256xf32, #tpu.memory_space<vmem>>, vector<8x256xf32>
    %c240_i32 = arith.constant 240 : i32
    %52 = tpu.dynamic_rotate %1 by %c240_i32 dim 1 : vector<8x256xf32>, i32 -> vector<8x256xf32>
    %53 = arith.mulf %52, %51 : vector<8x256xf32>
    %c56_46 = arith.constant 56 : index
    %c0_47 = arith.constant 0 : index
    %54 = vector.load %arg5[%c56_46, %c0_47] : memref<72x512xf32, #tpu.memory_space<vmem>>, vector<8x256xf32>
    tpu.vector_store %arg5[%c56_46, %c0_47], %53 {strides = array<i32>} : memref<72x512xf32, #tpu.memory_space<vmem>>, vector<8x256xf32>,
    %c240_i32_48 = arith.constant 240 : i32
    %55 = tpu.dynamic_rotate %3 by %c240_i32_48 dim 1 : vector<8x256xf32>, i32 -> vector<8x256xf32>
    %56 = arith.mulf %55, %51 : vector<8x256xf32>
    %c56_49 = arith.constant 56 : index
    %c256_50 = arith.constant 256 : index
    %57 = vector.load %arg5[%c56_49, %c256_50] : memref<72x512xf32, #tpu.memory_space<vmem>>, vector<8x256xf32>
    tpu.vector_store %arg5[%c56_49, %c256_50], %56 {strides = array<i32>} : memref<72x512xf32, #tpu.memory_space<vmem>>, vector<8x256xf32>,
    %c64 = arith.constant 64 : index
    %c0_51 = arith.constant 0 : index
    %58 = vector.load %arg3[%c64, %c0_51] : memref<72x256xf32, #tpu.memory_space<vmem>>, vector<8x256xf32>
    %c239_i32 = arith.constant 239 : i32
    %59 = tpu.dynamic_rotate %1 by %c239_i32 dim 1 : vector<8x256xf32>, i32 -> vector<8x256xf32>
    %60 = arith.mulf %59, %58 : vector<8x256xf32>
    %c64_52 = arith.constant 64 : index
    %c0_53 = arith.constant 0 : index
    %61 = vector.load %arg5[%c64_52, %c0_53] : memref<72x512xf32, #tpu.memory_space<vmem>>, vector<8x256xf32>
    tpu.vector_store %arg5[%c64_52, %c0_53], %60 {strides = array<i32>} : memref<72x512xf32, #tpu.memory_space<vmem>>, vector<8x256xf32>,
    %c239_i32_54 = arith.constant 239 : i32
    %62 = tpu.dynamic_rotate %3 by %c239_i32_54 dim 1 : vector<8x256xf32>, i32 -> vector<8x256xf32>
    %63 = arith.mulf %62, %58 : vector<8x256xf32>
    %c64_55 = arith.constant 64 : index
    %c256_56 = arith.constant 256 : index
    %64 = vector.load %arg5[%c64_55, %c256_56] : memref<72x512xf32, #tpu.memory_space<vmem>>, vector<8x256xf32>
    tpu.vector_store %arg5[%c64_55, %c256_56], %63 {strides = array<i32>} : memref<72x512xf32, #tpu.memory_space<vmem>>, vector<8x256xf32>,
    %c0_57 = arith.constant 0 : index
    %c0_58 = arith.constant 0 : index
    %65 = vector.load %arg2[%c0_57, %c0_58] : memref<8x72xf32, #tpu.memory_space<vmem>>, vector<8x72xf32>
    %c0_59 = arith.constant 0 : index
    %c0_60 = arith.constant 0 : index
    %66 = vector.load %arg5[%c0_59, %c0_60] : memref<72x512xf32, #tpu.memory_space<vmem>>, vector<72x512xf32>
    %cst = arith.constant dense<0.000000e+00> : vector<8x512xf32>
    %67 = tpu.matmul %65, %66, %cst {dimension_numbers = #tpu.dot_dimension_numbers<[1], [0], [0], [1], [0, 0, 1, 1], [], []>} : vector<8x72xf32>, vector<72x512xf32>, vector<8x512xf32> -> vector<8x512xf32>
    %68 = vector.extract_strided_slice %67 {offsets = [0, 0], sizes = [8, 256], strides = [1, 1]} : vector<8x512xf32> to vector<8x256xf32>
    %c0_61 = arith.constant 0 : index
    %c0_62 = arith.constant 0 : index
    %c0_63 = arith.constant 0 : index
    %69 = vector.load %arg4[%c0_61, %c0_62, %c0_63] : memref<2x8x256xf32, #tpu.memory_space<vmem>>, vector<1x8x256xf32>
    %70 = vector.shape_cast %69 : vector<1x8x256xf32> to vector<8x256xf32>
    %71 = vector.shape_cast %68 : vector<8x256xf32> to vector<1x8x256xf32>
    tpu.vector_store %arg4[%c0_61, %c0_62, %c0_63], %71 {strides = array<i32>} : memref<2x8x256xf32, #tpu.memory_space<vmem>>, vector<1x8x256xf32>,
    %72 = vector.extract_strided_slice %67 {offsets = [0, 256], sizes = [8, 256], strides = [1, 1]} : vector<8x512xf32> to vector<8x256xf32>
    %c1_64 = arith.constant 1 : index
    %c0_65 = arith.constant 0 : index
    %c0_66 = arith.constant 0 : index
    %73 = vector.load %arg4[%c1_64, %c0_65, %c0_66] : memref<2x8x256xf32, #tpu.memory_space<vmem>>, vector<1x8x256xf32>
    %74 = vector.shape_cast %73 : vector<1x8x256xf32> to vector<8x256xf32>
    %75 = vector.shape_cast %72 : vector<8x256xf32> to vector<1x8x256xf32>
    tpu.vector_store %arg4[%c1_64, %c0_65, %c0_66], %75 {strides = array<i32>} : memref<2x8x256xf32, #tpu.memory_space<vmem>>, vector<1x8x256xf32>,
    return
  }
  func.func @transform_0(%arg0: i32) -> (i32, i32, i32) {
    %c0_i32 = arith.constant 0 : i32
    %c0_i32_0 = arith.constant 0 : i32
    %c0_i32_1 = arith.constant 0 : i32
    return %arg0, %c0_i32, %c0_i32_0 : i32, i32, i32
  }
  func.func @transform_1(%arg0: i32) -> (i32, i32) {
    %c0_i32 = arith.constant 0 : i32
    %c0_i32_0 = arith.constant 0 : i32
    %c0_i32_1 = arith.constant 0 : i32
    return %c0_i32, %c0_i32_0 : i32, i32
  }
  func.func @transform_2(%arg0: i32) -> (i32, i32) {
    %c0_i32 = arith.constant 0 : i32
    %c0_i32_0 = arith.constant 0 : i32
    %c0_i32_1 = arith.constant 0 : i32
    return %c0_i32, %c0_i32_0 : i32, i32
  }
  func.func @transform_3(%arg0: i32) -> (i32, i32, i32) {
    %c0_i32 = arith.constant 0 : i32
    %c0_i32_0 = arith.constant 0 : i32
    %c0_i32_1 = arith.constant 0 : i32
    return %arg0, %c0_i32, %c0_i32_0 : i32, i32, i32
  }
}

</mosaic_0001>

<bundles_post_ra>
// kernel: tpu_custom_call.1
= control target key start
LH: loop header
LB: loop body
LE: loop exit
PB: predicated region body
PF: predicated region fallthrough
CT: control target
= control target key end

     0   :  { %8 = vsyncpa [#allocation4], 0  ;;  %s746_s0 = inlined_call_operand.hbm [shape: f32[2,8,256], index: 0, kind: input, shape index: {}]   ;;  %s747_s1 = inlined_call_operand.hbm [shape: f32[8,72], index: 1, kind: input, shape index: {}]   ;;  %s748_s2 = inlined_call_operand.hbm [shape: f32[72,256], index: 2, kind: input, shape index: {}]   ;;  %s749_s3 = inlined_call_operand.hbm [shape: f32[2,8,256], index: 3, kind: output, shape index: {}]  }
   0x1   :  { %9 = vsyncpa [#allocation7], 0  ;;  %s29_s14 = sshll.u32 %s747_s1, 4  ;;  %s30_s14 = int_to_ptr.hbm [resolvable:$true] %s29_s14 }
   0x2   :  { %10 = vsyncpa [#allocation5], 0  ;;  %s526_s15 = smov [#allocation6]   ;;  %s15_s19 = sshll.u32 %s746_s0, 4  ;;  %s16_s19 = int_to_ptr.hbm [resolvable:$true] %s15_s19 }
   0x3   :  { %s31_s16 = sshll.u32 %s526_s15, 4  ;;  %s527_s20 = smov [#allocation3]   ;;  %s32_s16 = int_to_ptr.vmem [resolvable:$true] %s31_s16 }
   0x4   :  { %34 = dma.hbm_to_vmem [thread:$0]  %s30_s14, 128, %s32_s16, [#allocation7]  }
   0x5   :  { %s17_s21 = sshll.u32 %s527_s20, 4  ;;  %s528_s22 = smov 256   ;;  %s18_s21 = int_to_ptr.vmem [resolvable:$true] %s17_s21 }
   0x6   :  { %s529_s23 = smov 16   ;;  %s39_s25 = sshll.u32 %s748_s2, 4  ;;  %s40_s25 = int_to_ptr.hbm [resolvable:$true] %s39_s25 }
   0x7   :  { %23 = dma.hbm_to_vmem [thread:$0]  %s16_s19, 512, %s18_s21, [#allocation4], %s528_s22, %s528_s22, %s529_s23  }
   0x8   :  { %s530_s26 = smov [#allocation8]  }
   0x9   :  { %s41_s27 = sshll.u32 %s530_s26, 4  ;;  %s42_s27 = int_to_ptr.vmem [resolvable:$true] %s41_s27 }
   0xa   :  { %47 = dma.hbm_to_vmem [thread:$0]  %s40_s25, 2304, %s42_s27, [#allocation7], %s528_s22, %s528_s22, %s529_s23  }
   0xb   :  { %520 = dma.done.wait [#allocation4], 512  }
   0xc   :  { %521 = vsyncadd [#allocation4], 4294966784 }
   0xd   :  { %522 = dma.done.wait [#allocation7], 2432  }
   0xe   :  { %523 = vsyncadd [#allocation7], 4294964864  ;;  %v574_v0 = vld [vmem:[#allocation3 + $0x10] sm:$0xff]  ;;  %s531_s0 = smov 112   ;;  %s532_s28 = smov 111   ;;  %v579_v1 = vld [vmem:[#allocation3 + $0x18] sm:$0xff]  ;;  %v71_v9 = vlaneseq }
   0xf   :  { %228 = vrot.lane.b32.xlu1 %v574_v0, %s531_s0  ;;  %251 = vrot.lane.b32.xlu0 %v574_v0, %s532_s28  ;;  %s533_s2 = smov 113   ;;  %s534_s29 = smov 127   ;;  %v586_v2 = vld [vmem:[#allocation3] sm:$0xff]  ;;  %v589_v3 = vld [vmem:[#allocation3 + $0x8] sm:$0xff]  ;;  %v239_v12 = vld [vmem:[#allocation8 + $0x88] sm:$0xff]  ;;  %vm298_vm8 = vcmask 588800  }
  0x10   :  { %205 = vrot.lane.b32.xlu2 %v574_v0, %s533_s2  ;;  %s535_s30 = smov 1   ;;  %s536_s4 = smov 15   ;;  %v618_v10 = vand.u32 127, %v71_v9  ;;  %v238_v11 = vld [vmem:[#allocation8 + $0x80] sm:$0xff]  ;;  %v215_v19 = vld [vmem:[#allocation8 + $0x70] sm:$0xff]  ;;  %v216_v20 = vld [vmem:[#allocation8 + $0x78] sm:$0xff] }
  0x11   :  { %s537_s5 = smov 17   ;;  %v635_v26 = vld [vmem:[#allocation8 + $0x60] sm:$0xff]  ;;  %v637_v27 = vld [vmem:[#allocation8 + $0x68] sm:$0xff]  ;;  %v642_v32 = vld [vmem:[#allocation8 + $0x50] sm:$0xff]  ;;  %s538_s6 = smov [#allocation9]  }
  0x12   :  { %vm221_vm0 = vcmp.lt.s32.totalorder %v618_v10, 112  ;;  %vm244_vm1 = vcmp.lt.s32.totalorder %v618_v10, 111  ;;  %vm198_vm2 = vcmp.lt.s32.totalorder %v618_v10, 113  ;;  %vm175_vm3 = vcmp.lt.s32.totalorder %v618_v10, 127  ;;  %v644_v33 = vld [vmem:[#allocation8 + $0x58] sm:$0xff]  ;;  %v646_v34 = vld [vmem:[#allocation8 + $0x40] sm:$0xff] }
  0x13   :  { %v648_v35 = vld [vmem:[#allocation8 + $0x48] sm:$0xff]  ;;  %v165_v42 = vmul.f32 %v646_v34, %v574_v0  ;;  %vm142_vm4 = vcmp.lt.s32.totalorder %v618_v10, 1  ;;  %v669_v56 = vld [vmem:[#allocation8 + $0x30] sm:$0xff]  ;;  %v671_v57 = vld [vmem:[#allocation8 + $0x38] sm:$0xff]  ;;  %vm119_vm5 = vcmp.lt.s32.totalorder %v618_v10, 15  ;;  %vm96_vm6 = vcmp.lt.s32.totalorder %v618_v10, 16 }
  0x14   :  { %v166_v43 = vmul.f32 %v648_v35, %v579_v1  ;;  %vm73_vm7 = vcmp.lt.s32.totalorder %v618_v10, 17  ;;  %s391_s7 = sshll.u32 %s538_s6, 4  ;;  %s393_s10 = sshll.u32 %s749_s3, 4  ;;  %s392_s7 = int_to_ptr.vmem [resolvable:$true] %s391_s7  ;;  %s394_s10 = int_to_ptr.hbm [resolvable:$true] %s393_s10 }
  0x17   :  { %230 = vrot.lane.b32.xlu1 %v579_v1, %s531_s0  ;;  %253 = vrot.lane.b32.xlu0 %v579_v1, %s532_s28 }
  0x18   :  { %207 = vrot.lane.b32.xlu2 %v579_v1, %s533_s2 }
  0x1f   :  { %184 = vrot.lane.b32.xlu1 %v579_v1, %s534_s29  ;;  %182 = vrot.lane.b32.xlu0 %v574_v0, %s534_s29 }
  0x20   :  { %240 = vrot.lane.b32.xlu2 %v586_v2, %s532_s28 }
  0x27   :  { %242 = vrot.lane.b32.xlu0 %v589_v3, %s532_s28  ;;  %217 = vrot.lane.b32.xlu1 %v586_v2, %s531_s0 }
  0x28   :  { %219 = vrot.lane.b32.xlu2 %v589_v3, %s531_s0 }
  0x2f   :  { %149 = vrot.lane.b32.xlu0 %v574_v0, %s535_s30  ;;  %151 = vrot.lane.b32.xlu1 %v579_v1, %s535_s30 }
  0x30   :  { %194 = vrot.lane.b32.xlu2 %v586_v2, %s533_s2 }
  0x37   :  { %196 = vrot.lane.b32.xlu0 %v589_v3, %s533_s2  ;;  %126 = vrot.lane.b32.xlu1 %v574_v0, %s536_s4 }
  0x38   :  { %128 = vrot.lane.b32.xlu2 %v579_v1, %s536_s4 }
  0x3f   :  { %171 = vrot.lane.b32.xlu0 %v586_v2, %s534_s29  ;;  %173 = vrot.lane.b32.xlu1 %v589_v3, %s534_s29 }
  0x40   :  { %103 = vrot.lane.b32.xlu2 %v574_v0, %s529_s23 }
  0x47   :  { %105 = vrot.lane.b32.xlu0 %v579_v1, %s529_s23  ;;  %80 = vrot.lane.b32.xlu1 %v574_v0, %s537_s5  ;;  %v680_v0 = vld [vmem:[#allocation8 + $0x20] sm:$0xff] }
  0x48   :  { %82 = vrot.lane.b32.xlu2 %v579_v1, %s537_s5  ;;  %v682_v1 = vld [vmem:[#allocation8 + $0x28] sm:$0xff] }
  0x4f   :  { %138 = vrot.lane.b32.xlu0 %v586_v2, %s535_s30  ;;  %140 = vrot.lane.b32.xlu1 %v589_v3, %s535_s30 }
  0x50   :  { %115 = vrot.lane.b32.xlu2 %v586_v2, %s536_s4 }
  0x57   :  { %117 = vrot.lane.b32.xlu0 %v589_v3, %s536_s4  ;;  %92 = vrot.lane.b32.xlu1 %v586_v2, %s529_s23 }
  0x58   :  { %94 = vrot.lane.b32.xlu2 %v589_v3, %s529_s23 }
  0x5f   :  { %67 = vrot.lane.b32.xlu0 %v586_v2, %s537_s5  ;;  %69 = vrot.lane.b32.xlu1 %v589_v3, %s537_s5 }
  0x6a   :  { %v206_v4 = vpop.permute.xlu2 %205 }
  0x72   :  { %v208_v5 = vpop.permute.xlu2 %207 }
  0x73   :  { %v209_v24 = vsel %vm198_vm2, %v206_v4, %v208_v5  ;;  %v210_v25 = vsel %vm198_vm2, %v208_v5, %v206_v4 }
  0x74   :  { %v211_v30 = vmul.f32 %v209_v24, %v635_v26  ;;  %v212_v31 = vmul.f32 %v210_v25, %v637_v27  ;;  %v162_v24 = vmul.f32 %v648_v35, %v589_v3  ;;  %v90_v25 = vld [vmem:[#allocation8 + $0x10] sm:$0xff] }
  0x7a   :  { %v241_v6 = vpop.permute.xlu2 %240 }
  0x81   :  { %v229_v7 = vpop.permute.xlu1 %228  ;;  %v252_v8 = vpop.permute.xlu0 %251 }
  0x82   :  { %v220_v21 = vpop.permute.xlu2 %219 }
  0x89   :  { %v231_v13 = vpop.permute.xlu1 %230  ;;  %v254_v14 = vpop.permute.xlu0 %253 }
  0x8a   :  { %v232_v15 = vsel %vm221_vm0, %v229_v7, %v231_v13  ;;  %v233_v16 = vsel %vm221_vm0, %v231_v13, %v229_v7  ;;  %v255_v17 = vsel %vm244_vm1, %v252_v8, %v254_v14  ;;  %v256_v18 = vsel %vm244_vm1, %v254_v14, %v252_v8  ;;  %v195_v44 = vpop.permute.xlu2 %194 }
  0x8b   :  { %v257_v22 = vmul.f32 %v255_v17, %v238_v11  ;;  %v258_v23 = vmul.f32 %v256_v18, %v239_v12  ;;  %v234_v28 = vmul.f32 %v232_v15, %v215_v19  ;;  %v235_v29 = vmul.f32 %v233_v16, %v216_v20 }
  0x8d   :  { %349 = vmatpush.msra.mxu2 %v257_v22  ;;  %369 = vmatpush.msra.mxu3 %v258_v23  ;;  %v161_v23 = vmul.f32 %v646_v34, %v586_v2 }
  0x8f   :  { %350 = vmatpush.msra.mxu2 %v234_v28  ;;  %370 = vmatpush.msra.mxu3 %v235_v29 }
  0x91   :  { %v185_v36 = vpop.permute.xlu1 %184  ;;  %351 = vmatpush.msra.mxu2 %v211_v30  ;;  %371 = vmatpush.msra.mxu3 %v212_v31  ;;  %v183_v37 = vpop.permute.xlu0 %182  ;;  %v65_v31 = vld [vmem:[#allocation8] sm:$0xff] }
  0x92   :  { %v186_v38 = vsel %vm175_vm3, %v183_v37, %v185_v36  ;;  %v187_v39 = vsel %vm175_vm3, %v185_v36, %v183_v37  ;;  %v129_v55 = vpop.permute.xlu2 %128 }
  0x93   :  { %v188_v40 = vmul.f32 %v186_v38, %v642_v32  ;;  %v189_v41 = vmul.f32 %v187_v39, %v644_v33  ;;  %v261_v38 = vld [vmem:[#allocation6] sm:$0xff] }
  0x95   :  { %352 = vmatpush.msra.mxu2 %v188_v40  ;;  %372 = vmatpush.msra.mxu3 %v189_v41 }
  0x97   :  { %353 = vmatpush.msra.mxu2 %v165_v42  ;;  %373 = vmatpush.msra.mxu3 %v166_v43 }
  0x99   :  { %v243_v45 = vpop.permute.xlu0 %242  ;;  %v218_v46 = vpop.permute.xlu1 %217 }
  0x9a   :  { %v222_v47 = vsel %vm221_vm0, %v218_v46, %v220_v21  ;;  %v223_v48 = vsel %vm221_vm0, %v220_v21, %v218_v46  ;;  %v245_v49 = vsel %vm244_vm1, %v241_v6, %v243_v45  ;;  %v246_v50 = vsel %vm244_vm1, %v243_v45, %v241_v6  ;;  %v104_v4 = vpop.permute.xlu2 %103 }
  0x9b   :  { %v247_v51 = vmul.f32 %v245_v49, %v238_v11  ;;  %v248_v52 = vmul.f32 %v246_v50, %v239_v12  ;;  %v224_v53 = vmul.f32 %v222_v47, %v215_v19  ;;  %v225_v54 = vmul.f32 %v223_v48, %v216_v20 }
  0x9d   :  { %309 = vmatpush.msra.mxu0 %v247_v51  ;;  %329 = vmatpush.msra.mxu1 %v248_v52 }
  0x9f   :  { %310 = vmatpush.msra.mxu0 %v224_v53  ;;  %330 = vmatpush.msra.mxu1 %v225_v54 }
  0xa1   :  { %v150_v58 = vpop.permute.xlu0 %149  ;;  %v152_v59 = vpop.permute.xlu1 %151 }
  0xa2   :  { %v153_v60 = vsel %vm142_vm4, %v150_v58, %v152_v59  ;;  %v154_v61 = vsel %vm142_vm4, %v152_v59, %v150_v58  ;;  %v83_v22 = vpop.permute.xlu2 %82 }
  0xa3   :  { %v155_v62 = vmul.f32 %v154_v61, %v669_v56  ;;  %v156_v63 = vmul.f32 %v153_v60, %v671_v57 }
  0xa5   :  { %354 = vmatpush.msra.mxu2 %v155_v62  ;;  %374 = vmatpush.msra.mxu3 %v156_v63 }
  0xa9   :  { %v197_v5 = vpop.permute.xlu0 %196  ;;  %v127_v6 = vpop.permute.xlu1 %126 }
  0xaa   :  { %v199_v7 = vsel %vm198_vm2, %v195_v44, %v197_v5  ;;  %v200_v8 = vsel %vm198_vm2, %v197_v5, %v195_v44  ;;  %v130_v9 = vsel %vm119_vm5, %v127_v6, %v129_v55  ;;  %v131_v11 = vsel %vm119_vm5, %v129_v55, %v127_v6  ;;  %v116_v37 = vpop.permute.xlu2 %115 }
  0xab   :  { %v201_v12 = vmul.f32 %v199_v7, %v635_v26  ;;  %v202_v13 = vmul.f32 %v200_v8, %v637_v27  ;;  %v132_v14 = vmul.f32 %v131_v11, %v680_v0  ;;  %v133_v15 = vmul.f32 %v130_v9, %v682_v1  ;;  %v91_v26 = vld [vmem:[#allocation8 + $0x18] sm:$0xff] }
  0xad   :  { %311 = vmatpush.msra.mxu0 %v201_v12  ;;  %331 = vmatpush.msra.mxu1 %v202_v13 }
  0xae   :  { %355 = vmatpush.msra.mxu2 %v132_v14  ;;  %375 = vmatpush.msra.mxu3 %v133_v15 }
  0xb1   :  { %v172_v16 = vpop.permute.xlu0 %171  ;;  %v174_v17 = vpop.permute.xlu1 %173 }
  0xb2   :  { %v176_v18 = vsel %vm175_vm3, %v172_v16, %v174_v17  ;;  %v177_v19 = vsel %vm175_vm3, %v174_v17, %v172_v16  ;;  %v95_v45 = vpop.permute.xlu2 %94 }
  0xb3   :  { %v178_v20 = vmul.f32 %v176_v18, %v642_v32  ;;  %v179_v21 = vmul.f32 %v177_v19, %v644_v33  ;;  %v66_v32 = vld [vmem:[#allocation8 + $0x8] sm:$0xff] }
  0xb5   :  { %312 = vmatpush.msra.mxu0 %v178_v20  ;;  %332 = vmatpush.msra.mxu1 %v179_v21 }
  0xb7   :  { %313 = vmatpush.msra.mxu0 %v161_v23  ;;  %333 = vmatpush.msra.mxu1 %v162_v24 }
  0xb9   :  { %v106_v27 = vpop.permute.xlu0 %105  ;;  %v81_v28 = vpop.permute.xlu1 %80 }
  0xba   :  { %v107_v29 = vsel %vm96_vm6, %v104_v4, %v106_v27  ;;  %v108_v2 = vsel %vm96_vm6, %v106_v27, %v104_v4  ;;  %v84_v3 = vsel %vm73_vm7, %v81_v28, %v83_v22  ;;  %v85_v30 = vsel %vm73_vm7, %v83_v22, %v81_v28 }
  0xbb   :  { %v109_v33 = vmul.f32 %v108_v2, %v90_v25  ;;  %v110_v34 = vmul.f32 %v107_v29, %v91_v26  ;;  %v86_v35 = vmul.f32 %v85_v30, %v65_v31  ;;  %v87_v36 = vmul.f32 %v84_v3, %v66_v32 }
  0xbd   :  { %356 = vmatpush.msra.mxu2 %v109_v33  ;;  %376 = vmatpush.msra.mxu3 %v110_v34 }
  0xbf   :  { %357 = vmatpush.msra.mxu2 %v86_v35  ;;  %377 = vmatpush.msra.mxu3 %v87_v36 }
  0xc0   :  { %409 = vmatmul.msk.f32.vlgmr.msra.gmra.mxu2 %vm298_vm8, %v261_v38  ;;  %410 = vmatmul.msk.f32.vlgmr.msra.gmra.mxu3 %vm298_vm8, %v261_v38 }
  0xc1   :  { %v139_v39 = vpop.permute.xlu0 %138  ;;  %v141_v40 = vpop.permute.xlu1 %140 }
  0xc2   :  { %v143_v41 = vsel %vm142_vm4, %v139_v39, %v141_v40  ;;  %v144_v42 = vsel %vm142_vm4, %v141_v40, %v139_v39 }
  0xc3   :  { %v145_v43 = vmul.f32 %v144_v42, %v669_v56  ;;  %v146_v44 = vmul.f32 %v143_v41, %v671_v57 }
  0xc5   :  { %314 = vmatpush.msra.mxu0 %v145_v43  ;;  %334 = vmatpush.msra.mxu1 %v146_v44 }
  0xc9   :  { %v118_v46 = vpop.permute.xlu0 %117  ;;  %v93_v47 = vpop.permute.xlu1 %92 }
  0xca   :  { %v120_v48 = vsel %vm119_vm5, %v116_v37, %v118_v46  ;;  %v121_v49 = vsel %vm119_vm5, %v118_v46, %v116_v37  ;;  %v97_v50 = vsel %vm96_vm6, %v93_v47, %v95_v45  ;;  %v98_v51 = vsel %vm96_vm6, %v95_v45, %v93_v47 }
  0xcb   :  { %v122_v52 = vmul.f32 %v121_v49, %v680_v0  ;;  %v123_v53 = vmul.f32 %v120_v48, %v682_v1  ;;  %v99_v54 = vmul.f32 %v98_v51, %v90_v25  ;;  %v100_v55 = vmul.f32 %v97_v50, %v91_v26 }
  0xcd   :  { %315 = vmatpush.msra.mxu0 %v122_v52  ;;  %335 = vmatpush.msra.mxu1 %v123_v53 }
  0xcf   :  { %316 = vmatpush.msra.mxu0 %v99_v54  ;;  %336 = vmatpush.msra.mxu1 %v100_v55 }
  0xd1   :  { %v68_v56 = vpop.permute.xlu0 %67  ;;  %v70_v57 = vpop.permute.xlu1 %69 }
  0xd2   :  { %v74_v58 = vsel %vm73_vm7, %v68_v56, %v70_v57  ;;  %v75_v59 = vsel %vm73_vm7, %v70_v57, %v68_v56 }
  0xd3   :  { %v76_v60 = vmul.f32 %v75_v59, %v65_v31  ;;  %v77_v61 = vmul.f32 %v74_v58, %v66_v32 }
  0xd5   :  { %317 = vmatpush.msra.mxu0 %v76_v60  ;;  %337 = vmatpush.msra.mxu1 %v77_v61 }
  0xd6   :  { %407 = vmatmul.msk.f32.vlgmr.msra.gmra.mxu0 %vm298_vm8, %v261_v38  ;;  %408 = vmatmul.msk.f32.vlgmr.msra.gmra.mxu1 %vm298_vm8, %v261_v38 }
 0x143   :  { %v359_v62 = vpop.f32.mrf.mxu2  ;;  %v379_v63 = vpop.f32.mrf.mxu3 }
 0x144   :  { %385 = vst [vmem:[#allocation9 + $0x10] sm:$0xff] %v359_v62 }
 0x145   :  { %386 = vst [vmem:[#allocation9 + $0x18] sm:$0xff] %v379_v63 }
 0x153   :  { %v319_v10 = vpop.f32.mrf.mxu0  ;;  %v339_v0 = vpop.f32.mrf.mxu1 }
 0x154   :  { %382 = vst [vmem:[#allocation9] sm:$0xff] %v319_v10 }
 0x155   :  { %383 = vst [vmem:[#allocation9 + $0x8] sm:$0xff] %v339_v0 }
 0x156   :  { %399 = dma.vmem_to_hbm [thread:$0]  %s392_s7, 512, %s394_s10, [#allocation5], %s528_s22, %s528_s22, %s529_s23  }
 0x157   :  { %524 = dma.done.wait [#allocation5], 512  }
 0x158   :  { %525 = vsyncadd [#allocation5], 4294966784 }
 0x159   :  { %404 = vsyncpa [#allocation4], 1 }
 0x15a   :  { %405 = vsyncpa [#allocation7], 1 }
 0x15b   :  { %406 = vsyncpa [#allocation5], 1 }

</bundles_post_ra>
